<compile_context>
chip_gen: v7x
topology: tpu7x:2x2x1
jax: 0.10.0
libtpu: 0.0.40
codegen_flags: <defaults>
</compile_context>

<pallas_src>
import jax
import jax.numpy as jnp
from jax.experimental import pallas as pl
from jax.experimental.pallas import tpu as pltpu

LANE = 128
SUBLANE = 8


def _etc_kernel(h_ref, ep_ref, lbl_ref, w_ref, b_ref, logits_ref, loss_ref):
    """One grid step handles a tile of TB examples.

    h_ref:      (TB, S, H) bf16   hidden states
    ep_ref:     (TB, S)    f32    entity_place rows
    lbl_ref:    (TB, 1)    int32  labels
    w_ref:      (H, Cp)    f32    classifier weight, C lane-padded to Cp with zeros
    b_ref:      (1, Cp)    f32    classifier bias, padded lanes = -1e30 (finite, NOT -inf)
    logits_ref: (TB, Cp)   f32    logits (lane-dense)
    loss_ref:   (TB, 1)    f32    per-example CE loss
    """
    _, s_len, _ = h_ref.shape

    # entity_place / sum(entity_place, dim=1, keepdim=True)
    ep = ep_ref[...]                                          # (TB, S)
    denom = jnp.sum(ep, axis=-1, keepdims=True)               # (TB, 1)
    # Guard: garbage rows of a ragged last tile (or degenerate all-zero masks) must not
    # divide by zero; exact for any row with a non-zero mask; OOB rows are dropped anyway.
    p = ep / jnp.where(denom != 0.0, denom, 1.0)              # (TB, S)

    # Weighted pooling over the sequence: unrolled FMA into a (TB, H) f32 accumulator.
    # Keeps the MXU free and never materializes a (TB, S, H) f32 temporary (spill risk).
    acc = p[:, 0:1] * h_ref[:, 0, :].astype(jnp.float32)      # (TB, H)
    for s in range(1, s_len):
        acc = acc + p[:, s:s + 1] * h_ref[:, s, :].astype(jnp.float32)

    # Classifier: one full-tile MXU matmul, Linear(768, num_class).
    logits = jnp.dot(acc, w_ref[...], preferred_element_type=jnp.float32) + b_ref[...]
    logits_ref[...] = logits                                   # (TB, Cp), lane-dense

    # CrossEntropy per example: logsumexp(logits) - logits[label]
    m = jnp.max(logits, axis=-1, keepdims=True)
    lse = m + jnp.log(jnp.sum(jnp.exp(logits - m), axis=-1, keepdims=True))
    col = jax.lax.broadcasted_iota(jnp.int32, logits.shape, 1)
    correct = jnp.sum(jnp.where(col == lbl_ref[...], logits, 0.0),
                      axis=-1, keepdims=True)                  # (TB, 1)
    loss_ref[...] = lse - correct


def _vmem_limit_bytes():
    """Generation-aware scoped-VMEM limit (≈48 MiB on v7x, ≈96-100 MiB on v5e/v6e)."""
    try:
        cap = pltpu.get_tpu_info().vmem_capacity_bytes
    except Exception:
        cap = 64 * 1024 * 1024   # conservative (v7x-sized) fallback
    return int(min(cap * 3 // 4, 100 * 1024 * 1024))


def entity_type_classification_forward(h, entity_place, labels, w, bias):
    """h: (B,S,H), entity_place: (B,S), labels: (B,) int, w: (H,C), bias: (C,)
    -> (loss scalar, logits (B, C)). Matches nn.Linear(768, C) + CrossEntropyLoss(mean)."""
    B, S, H = h.shape
    C = w.shape[1]
    Cp = pl.cdiv(C, LANE) * LANE                  # lane-pad num_class to 128
    f32 = jnp.float32

    # Stream hidden states in bf16: halves HBM traffic for the dominant array.
    h_bf16 = h.astype(jnp.bfloat16)
    ep = entity_place.astype(f32)
    lbl = labels.astype(jnp.int32).reshape(B, 1)
    wp = jnp.zeros((H, Cp), f32).at[:, :C].set(w.astype(f32))
    # Keep the pad finite (-1e30, NOT -inf): it must vanish in logsumexp without NaN.
    bp = jnp.full((1, Cp), -1e30, f32).at[0, :C].set(bias.astype(f32))

    # Batch tile: h is double-buffered, so budget ~1/4 of the scoped VMEM limit per
    # buffer; cap at 256 (fills v6e/v7x MXU rows, large DMAs, fewer grid steps).
    vmem_limit = _vmem_limit_bytes()
    per_buf_budget = vmem_limit // 4
    bytes_per_example = S * H * 2                 # bf16
    tb_mem = max(SUBLANE, per_buf_budget // max(bytes_per_example, 1))
    # TODO(synk): for very large S*H (one example slab exceeding the budget), also tile S.
    TB_max = min(256, tb_mem)
    if B <= TB_max:
        TB = B                                    # single exact tile, no ragged handling
    else:
        TB = max(SUBLANE, (TB_max // SUBLANE) * SUBLANE)   # ragged last tile -> OOB masked
    grid = (pl.cdiv(B, TB),)

    grid_spec = pltpu.PrefetchScalarGridSpec(
        num_scalar_prefetch=0,
        grid=grid,
        in_specs=[
            pl.BlockSpec((TB, S, H), lambda i: (i, 0, 0)),   # hidden states tile (bf16)
            pl.BlockSpec((TB, S), lambda i: (i, 0)),         # entity_place tile
            pl.BlockSpec((TB, 1), lambda i: (i, 0)),         # labels tile (int32)
            pl.BlockSpec((H, Cp), lambda i: (0, 0)),         # classifier weight (resident)
            pl.BlockSpec((1, Cp), lambda i: (0, 0)),         # classifier bias (resident)
        ],
        out_specs=(
            pl.BlockSpec((TB, Cp), lambda i: (i, 0)),        # logits (lane-dense)
            pl.BlockSpec((TB, 1), lambda i: (i, 0)),         # per-example CE loss
        ),
    )

    logits_p, per_loss = pl.pallas_call(
        _etc_kernel,
        out_shape=(
            jax.ShapeDtypeStruct((B, Cp), f32),
            jax.ShapeDtypeStruct((B, 1), f32),
        ),
        grid_spec=grid_spec,
        compiler_params=pltpu.CompilerParams(
            dimension_semantics=("parallel",),    # tiles independent -> megacore-shardable
            vmem_limit_bytes=vmem_limit,
        ),
    )(h_bf16, ep, lbl, wp, bp)

    logits = logits_p[:, :C]
    loss = jnp.mean(per_loss[:, 0])               # CrossEntropyLoss mean reduction
    return loss, logits


def _reference(h, entity_place, labels, w, bias):
    hf = h.astype(jnp.float32)
    ep = entity_place.astype(jnp.float32)
    ep = ep / jnp.sum(ep, axis=1, keepdims=True)
    h_entity = jnp.einsum("bs,bsh->bh", ep, hf,
                          precision=jax.lax.Precision.HIGHEST)
    logits = jnp.dot(h_entity, w, precision=jax.lax.Precision.HIGHEST) + bias
    logp = jax.nn.log_softmax(logits, axis=-1)
    loss = -jnp.mean(jnp.take_along_axis(logp, labels[:, None], axis=-1))
    return loss, logits


if __name__ == "__main__":
    # Small shapes consistent with the module's forward.
    B, S, H, C, VOCAB = 2, 8, 768, 16, 100

    key = jax.random.PRNGKey(0)
    k_emb, k_x, k_w, k_b, k_lbl = jax.random.split(key, 5)

    # Deterministic parameters.
    embed_table = jax.random.normal(k_emb, (VOCAB, H), dtype=jnp.float32) * 0.02
    w = jax.random.normal(k_w, (H, C), dtype=jnp.float32) * 0.02
    bias = jax.random.normal(k_b, (C,), dtype=jnp.float32) * 0.02

    # Inputs.
    x = jax.random.randint(k_x, (B, S), 0, VOCAB, dtype=jnp.int32)            # token ids
    entity_place = jnp.array([[0, 1, 1, 0, 0, 0, 0, 0],
                              [0, 0, 0, 1, 1, 1, 0, 0]], dtype=jnp.float32)   # (B, S) mask
    labels = jax.random.randint(k_lbl, (B,), 0, C, dtype=jnp.int32)

    # "BERT" hidden states (see TODO above): deterministic embedding lookup, stored bf16
    # so both kernel and reference see identical (bf16-rounded) hidden states.
    h = embed_table[x].astype(jnp.bfloat16)                                   # (B, S, H)

    loss, logits = entity_type_classification_forward(h, entity_place, labels, w, bias)
    jax.block_until_ready((loss, logits))

    ref_loss, ref_logits = _reference(h, entity_place, labels, w, bias)
    assert jnp.allclose(logits, ref_logits, atol=1e-3, rtol=1e-3)
    assert jnp.allclose(loss, ref_loss, atol=1e-3, rtol=1e-3)

    print("KERNEL_OK")
</pallas_src>

<mosaic_0001>
module attributes {stable_mosaic.version = 11 : i64} {
  func.func @_etc_kernel(%arg0: i32, %arg1: memref<2x8x768xbf16, #tpu.memory_space<vmem>>, %arg2: memref<2x8xf32, #tpu.memory_space<vmem>>, %arg3: memref<2x1xi32, #tpu.memory_space<vmem>>, %arg4: memref<768x128xf32, #tpu.memory_space<vmem>>, %arg5: memref<1x128xf32, #tpu.memory_space<vmem>>, %arg6: memref<2x128xf32, #tpu.memory_space<vmem>>, %arg7: memref<2x1xf32, #tpu.memory_space<vmem>>) attributes {dimension_semantics = [#tpu.dimension_semantics<parallel>], iteration_bounds = array<i64: 1>, scalar_prefetch = 0 : i64, scratch_operands = 0 : i64, tpu.core_type = #tpu.core_type<tc>, window_params = [{transform_indices = @transform_0, window_bounds = array<i64: 2, 8, 768>}, {transform_indices = @transform_1, window_bounds = array<i64: 2, 8>}, {transform_indices = @transform_2, window_bounds = array<i64: 2, 1>}, {pipeline_mode = #tpu.pipeline_mode<synchronous>, transform_indices = @transform_3, window_bounds = array<i64: 768, 128>}, {pipeline_mode = #tpu.pipeline_mode<synchronous>, transform_indices = @transform_4, window_bounds = array<i64: 1, 128>}, {transform_indices = @transform_5, window_bounds = array<i64: 2, 128>}, {transform_indices = @transform_6, window_bounds = array<i64: 2, 1>}]} {
    %c0 = arith.constant 0 : index
    %c0_0 = arith.constant 0 : index
    %0 = vector.load %arg2[%c0, %c0_0] : memref<2x8xf32, #tpu.memory_space<vmem>>, vector<2x8xf32>
    %cst = arith.constant dense<0.000000e+00> : vector<2xf32>
    %1 = vector.multi_reduction <add>, %0, %cst [1] : vector<2x8xf32> to vector<2xf32>
    %2 = vector.shape_cast %1 : vector<2xf32> to vector<2x1xf32>
    %cst_1 = arith.constant 0.000000e+00 : f32
    %3 = vector.broadcast %cst_1 : f32 to vector<2x1xf32>
    %4 = arith.cmpf one, %2, %3 : vector<2x1xf32>
    %cst_2 = arith.constant 1.000000e+00 : f32
    %5 = vector.broadcast %cst_2 : f32 to vector<2x1xf32>
    %6 = arith.select %4, %2, %5 : vector<2x1xi1>, vector<2x1xf32>
    %7 = vector.broadcast %6 : vector<2x1xf32> to vector<2x8xf32>
    %8 = arith.divf %0, %7 : vector<2x8xf32>
    %9 = vector.extract_strided_slice %8 {offsets = [0, 0], sizes = [2, 1], strides = [1, 1]} : vector<2x8xf32> to vector<2x1xf32>
    %c0_3 = arith.constant 0 : index
    %c0_4 = arith.constant 0 : index
    %c0_5 = arith.constant 0 : index
    %10 = vector.load %arg1[%c0_3, %c0_4, %c0_5] : memref<2x8x768xbf16, #tpu.memory_space<vmem>>, vector<2x1x768xbf16>
    %11 = vector.shape_cast %10 : vector<2x1x768xbf16> to vector<2x768xbf16>
    %12 = arith.extf %11 : vector<2x768xbf16> to vector<2x768xf32>
    %13 = vector.broadcast %9 : vector<2x1xf32> to vector<2x768xf32>
    %14 = arith.mulf %13, %12 : vector<2x768xf32>
    %15 = vector.extract_strided_slice %8 {offsets = [0, 1], sizes = [2, 1], strides = [1, 1]} : vector<2x8xf32> to vector<2x1xf32>
    %c0_6 = arith.constant 0 : index
    %c1 = arith.constant 1 : index
    %c0_7 = arith.constant 0 : index
    %16 = vector.load %arg1[%c0_6, %c1, %c0_7] : memref<2x8x768xbf16, #tpu.memory_space<vmem>>, vector<2x1x768xbf16>
    %17 = vector.shape_cast %16 : vector<2x1x768xbf16> to vector<2x768xbf16>
    %18 = arith.extf %17 : vector<2x768xbf16> to vector<2x768xf32>
    %19 = vector.broadcast %15 : vector<2x1xf32> to vector<2x768xf32>
    %20 = arith.mulf %19, %18 : vector<2x768xf32>
    %21 = arith.addf %14, %20 : vector<2x768xf32>
    %22 = vector.extract_strided_slice %8 {offsets = [0, 2], sizes = [2, 1], strides = [1, 1]} : vector<2x8xf32> to vector<2x1xf32>
    %c0_8 = arith.constant 0 : index
    %c2 = arith.constant 2 : index
    %c0_9 = arith.constant 0 : index
    %23 = vector.load %arg1[%c0_8, %c2, %c0_9] : memref<2x8x768xbf16, #tpu.memory_space<vmem>>, vector<2x1x768xbf16>
    %24 = vector.shape_cast %23 : vector<2x1x768xbf16> to vector<2x768xbf16>
    %25 = arith.extf %24 : vector<2x768xbf16> to vector<2x768xf32>
    %26 = vector.broadcast %22 : vector<2x1xf32> to vector<2x768xf32>
    %27 = arith.mulf %26, %25 : vector<2x768xf32>
    %28 = arith.addf %21, %27 : vector<2x768xf32>
    %29 = vector.extract_strided_slice %8 {offsets = [0, 3], sizes = [2, 1], strides = [1, 1]} : vector<2x8xf32> to vector<2x1xf32>
    %c0_10 = arith.constant 0 : index
    %c3 = arith.constant 3 : index
    %c0_11 = arith.constant 0 : index
    %30 = vector.load %arg1[%c0_10, %c3, %c0_11] : memref<2x8x768xbf16, #tpu.memory_space<vmem>>, vector<2x1x768xbf16>
    %31 = vector.shape_cast %30 : vector<2x1x768xbf16> to vector<2x768xbf16>
    %32 = arith.extf %31 : vector<2x768xbf16> to vector<2x768xf32>
    %33 = vector.broadcast %29 : vector<2x1xf32> to vector<2x768xf32>
    %34 = arith.mulf %33, %32 : vector<2x768xf32>
    %35 = arith.addf %28, %34 : vector<2x768xf32>
    %36 = vector.extract_strided_slice %8 {offsets = [0, 4], sizes = [2, 1], strides = [1, 1]} : vector<2x8xf32> to vector<2x1xf32>
    %c0_12 = arith.constant 0 : index
    %c4 = arith.constant 4 : index
    %c0_13 = arith.constant 0 : index
    %37 = vector.load %arg1[%c0_12, %c4, %c0_13] : memref<2x8x768xbf16, #tpu.memory_space<vmem>>, vector<2x1x768xbf16>
    %38 = vector.shape_cast %37 : vector<2x1x768xbf16> to vector<2x768xbf16>
    %39 = arith.extf %38 : vector<2x768xbf16> to vector<2x768xf32>
    %40 = vector.broadcast %36 : vector<2x1xf32> to vector<2x768xf32>
    %41 = arith.mulf %40, %39 : vector<2x768xf32>
    %42 = arith.addf %35, %41 : vector<2x768xf32>
    %43 = vector.extract_strided_slice %8 {offsets = [0, 5], sizes = [2, 1], strides = [1, 1]} : vector<2x8xf32> to vector<2x1xf32>
    %c0_14 = arith.constant 0 : index
    %c5 = arith.constant 5 : index
    %c0_15 = arith.constant 0 : index
    %44 = vector.load %arg1[%c0_14, %c5, %c0_15] : memref<2x8x768xbf16, #tpu.memory_space<vmem>>, vector<2x1x768xbf16>
    %45 = vector.shape_cast %44 : vector<2x1x768xbf16> to vector<2x768xbf16>
    %46 = arith.extf %45 : vector<2x768xbf16> to vector<2x768xf32>
    %47 = vector.broadcast %43 : vector<2x1xf32> to vector<2x768xf32>
    %48 = arith.mulf %47, %46 : vector<2x768xf32>
    %49 = arith.addf %42, %48 : vector<2x768xf32>
    %50 = vector.extract_strided_slice %8 {offsets = [0, 6], sizes = [2, 1], strides = [1, 1]} : vector<2x8xf32> to vector<2x1xf32>
    %c0_16 = arith.constant 0 : index
    %c6 = arith.constant 6 : index
    %c0_17 = arith.constant 0 : index
    %51 = vector.load %arg1[%c0_16, %c6, %c0_17] : memref<2x8x768xbf16, #tpu.memory_space<vmem>>, vector<2x1x768xbf16>
    %52 = vector.shape_cast %51 : vector<2x1x768xbf16> to vector<2x768xbf16>
    %53 = arith.extf %52 : vector<2x768xbf16> to vector<2x768xf32>
    %54 = vector.broadcast %50 : vector<2x1xf32> to vector<2x768xf32>
    %55 = arith.mulf %54, %53 : vector<2x768xf32>
    %56 = arith.addf %49, %55 : vector<2x768xf32>
    %57 = vector.extract_strided_slice %8 {offsets = [0, 7], sizes = [2, 1], strides = [1, 1]} : vector<2x8xf32> to vector<2x1xf32>
    %c0_18 = arith.constant 0 : index
    %c7 = arith.constant 7 : index
    %c0_19 = arith.constant 0 : index
    %58 = vector.load %arg1[%c0_18, %c7, %c0_19] : memref<2x8x768xbf16, #tpu.memory_space<vmem>>, vector<2x1x768xbf16>
    %59 = vector.shape_cast %58 : vector<2x1x768xbf16> to vector<2x768xbf16>
    %60 = arith.extf %59 : vector<2x768xbf16> to vector<2x768xf32>
    %61 = vector.broadcast %57 : vector<2x1xf32> to vector<2x768xf32>
    %62 = arith.mulf %61, %60 : vector<2x768xf32>
    %63 = arith.addf %56, %62 : vector<2x768xf32>
    %c0_20 = arith.constant 0 : index
    %c0_21 = arith.constant 0 : index
    %64 = vector.load %arg4[%c0_20, %c0_21] : memref<768x128xf32, #tpu.memory_space<vmem>>, vector<768x128xf32>
    %cst_22 = arith.constant dense<0.000000e+00> : vector<2x128xf32>
    %65 = tpu.matmul %63, %64, %cst_22 {dimension_numbers = #tpu.dot_dimension_numbers<[1], [0], [0], [1], [0, 0, 1, 1], [], []>} : vector<2x768xf32>, vector<768x128xf32>, vector<2x128xf32> -> vector<2x128xf32>
    %c0_23 = arith.constant 0 : index
    %c0_24 = arith.constant 0 : index
    %66 = vector.load %arg5[%c0_23, %c0_24] : memref<1x128xf32, #tpu.memory_space<vmem>>, vector<1x128xf32>
    %67 = vector.broadcast %66 : vector<1x128xf32> to vector<2x128xf32>
    %68 = arith.addf %65, %67 : vector<2x128xf32>
    %c0_25 = arith.constant 0 : index
    %c0_26 = arith.constant 0 : index
    %69 = vector.load %arg6[%c0_25, %c0_26] : memref<2x128xf32, #tpu.memory_space<vmem>>, vector<2x128xf32>
    tpu.vector_store %arg6[%c0_25, %c0_26], %68 {strides = array<i32>} : memref<2x128xf32, #tpu.memory_space<vmem>>, vector<2x128xf32>,
    %cst_27 = arith.constant dense<0xFF800000> : vector<2xf32>
    %70 = vector.multi_reduction <maximumf>, %68, %cst_27 [1] : vector<2x128xf32> to vector<2xf32>
    %71 = vector.shape_cast %70 : vector<2xf32> to vector<2x1xf32>
    %72 = vector.broadcast %71 : vector<2x1xf32> to vector<2x128xf32>
    %73 = arith.subf %68, %72 : vector<2x128xf32>
    %74 = math.exp %73 : vector<2x128xf32>
    %cst_28 = arith.constant dense<0.000000e+00> : vector<2xf32>
    %75 = vector.multi_reduction <add>, %74, %cst_28 [1] : vector<2x128xf32> to vector<2xf32>
    %76 = vector.shape_cast %75 : vector<2xf32> to vector<2x1xf32>
    %77 = math.log %76 : vector<2x1xf32>
    %78 = arith.addf %71, %77 : vector<2x1xf32>
    %79 = tpu.iota {dimensions = array<i32: 1>} : vector<2x128xi32>
    %c0_29 = arith.constant 0 : index
    %c0_30 = arith.constant 0 : index
    %80 = vector.load %arg3[%c0_29, %c0_30] : memref<2x1xi32, #tpu.memory_space<vmem>>, vector<2x1xi32>
    %81 = vector.broadcast %80 : vector<2x1xi32> to vector<2x128xi32>
    %82 = arith.cmpi eq, %79, %81 : vector<2x128xi32>
    %cst_31 = arith.constant 0.000000e+00 : f32
    %83 = vector.broadcast %cst_31 : f32 to vector<2x128xf32>
    %84 = arith.select %82, %68, %83 : vector<2x128xi1>, vector<2x128xf32>
    %cst_32 = arith.constant dense<0.000000e+00> : vector<2xf32>
    %85 = vector.multi_reduction <add>, %84, %cst_32 [1] : vector<2x128xf32> to vector<2xf32>
    %86 = vector.shape_cast %85 : vector<2xf32> to vector<2x1xf32>
    %87 = arith.subf %78, %86 : vector<2x1xf32>
    %c0_33 = arith.constant 0 : index
    %c0_34 = arith.constant 0 : index
    %88 = vector.load %arg7[%c0_33, %c0_34] : memref<2x1xf32, #tpu.memory_space<vmem>>, vector<2x1xf32>
    tpu.vector_store %arg7[%c0_33, %c0_34], %87 {strides = array<i32>} : memref<2x1xf32, #tpu.memory_space<vmem>>, vector<2x1xf32>,
    return
  }
  func.func @transform_0(%arg0: i32) -> (i32, i32, i32) {
    %c0_i32 = arith.constant 0 : i32
    %c0_i32_0 = arith.constant 0 : i32
    %c0_i32_1 = arith.constant 0 : i32
    return %arg0, %c0_i32, %c0_i32_0 : i32, i32, i32
  }
  func.func @transform_1(%arg0: i32) -> (i32, i32) {
    %c0_i32 = arith.constant 0 : i32
    %c0_i32_0 = arith.constant 0 : i32
    return %arg0, %c0_i32 : i32, i32
  }
  func.func @transform_2(%arg0: i32) -> (i32, i32) {
    %c0_i32 = arith.constant 0 : i32
    %c0_i32_0 = arith.constant 0 : i32
    return %arg0, %c0_i32 : i32, i32
  }
  func.func @transform_3(%arg0: i32) -> (i32, i32) {
    %c0_i32 = arith.constant 0 : i32
    %c0_i32_0 = arith.constant 0 : i32
    %c0_i32_1 = arith.constant 0 : i32
    return %c0_i32, %c0_i32_0 : i32, i32
  }
  func.func @transform_4(%arg0: i32) -> (i32, i32) {
    %c0_i32 = arith.constant 0 : i32
    %c0_i32_0 = arith.constant 0 : i32
    %c0_i32_1 = arith.constant 0 : i32
    return %c0_i32, %c0_i32_0 : i32, i32
  }
  func.func @transform_5(%arg0: i32) -> (i32, i32) {
    %c0_i32 = arith.constant 0 : i32
    %c0_i32_0 = arith.constant 0 : i32
    return %arg0, %c0_i32 : i32, i32
  }
  func.func @transform_6(%arg0: i32) -> (i32, i32) {
    %c0_i32 = arith.constant 0 : i32
    %c0_i32_0 = arith.constant 0 : i32
    return %arg0, %c0_i32 : i32, i32
  }
}

</mosaic_0001>

<bundles_post_ra>
// kernel: tpu_custom_call.1
= control target key start
LH: loop header
LB: loop body
LE: loop exit
PB: predicated region body
PF: predicated region fallthrough
CT: control target
= control target key end

     0   :  { %12 = vsyncpa [#allocation3], 0  ;;  %s1587_s0 = inlined_call_operand.hbm [shape: bf16[2,8,768], index: 0, kind: input, shape index: {}]   ;;  %s1588_s1 = inlined_call_operand.vmem [shape: f32[2,8], index: 1, kind: input, shape index: {}]   ;;  %s1589_s2 = inlined_call_operand.vmem [shape: s32[2,1], index: 2, kind: input, shape index: {}]   ;;  %s1590_s3 = inlined_call_operand.hbm [shape: f32[768,128], index: 3, kind: input, shape index: {}]   ;;  %s1591_s4 = inlined_call_operand.vmem [shape: f32[1,128], index: 4, kind: input, shape index: {}]   ;;  %s1592_s5 = inlined_call_operand.hbm [shape: f32[2,128], index: 5, kind: output, shape index: {0}]   ;;  %s1593_s6 = inlined_call_operand.vmem [shape: f32[2,1], index: 6, kind: output, shape index: {1}]  }
   0x1   :  { %13 = vsyncpa [#allocation6], 0 }
   0x2   :  { %14 = vsyncpa [#allocation4], 0  ;;  %s1148_s21 = smov [#allocation2]   ;;  %s1076_s25 = scalar_lea.hbm %s1587_s0, 768 }
   0x3   :  { %s20_s22 = sshll.u32 %s1148_s21, 4  ;;  %p1077_p0 = scmp.ne.s32.totalorder %s1587_s0, %s1076_s25  ;;  %s21_s22 = int_to_ptr.vmem [resolvable:$true] %s20_s22 }
   0x4   :  { %p1080_p1 = scmp.lt.u32.totalorder %s1076_s25, %s1587_s0 }
   0x6   :  { %p1082_p2 = pnand %p1080_p1, %p1077_p0 }
   0x8   :  { %1085 = shalt.err (!%p1082_p2)
}
   0x9   :  { %s1086_s30 = scalar_lea.vmem %s21_s22, 768  ;;  %p1091_p4 = scmp.lt.s32.totalorder %s21_s22, %s21_s22 }
   0xa   :  { %p1087_p3 = scmp.ne.s32.totalorder %s21_s22, %s1086_s30  ;;  %p1092_p5 = scmp.lt.s32.totalorder %s1086_s30, %s1086_s30 }
   0xc   :  { %p1093_p6 = por %p1092_p5, %p1091_p4 }
   0xe   :  { %p1094_p7 = pnand %p1093_p6, %p1087_p3 }
  0x10   :  { %1097 = shalt.err (!%p1094_p7)
}
  0x11   :  { %s1149_s7 = smov 384   ;;  %s1150_s8 = smov 24  }
  0x12   :  { %26 = dma.hbm_to_vmem [thread:$0]  %s1587_s0, 768, %s21_s22, [#allocation3], %s1149_s7, %s1149_s7, %s1150_s8  }
  0x13   :  { %s1151_s11 = smov [#allocation5]   ;;  %s1098_s15 = scalar_lea.hbm %s1590_s3, 12288 }
  0x14   :  { %s36_s12 = sshll.u32 %s1151_s11, 4  ;;  %p1099_p8 = scmp.ne.s32.totalorder %s1590_s3, %s1098_s15  ;;  %s37_s12 = int_to_ptr.vmem [resolvable:$true] %s36_s12 }
  0x15   :  { %p1102_p9 = scmp.lt.u32.totalorder %s1098_s15, %s1590_s3 }
  0x17   :  { %p1104_p10 = pnand %p1102_p9, %p1099_p8 }
  0x19   :  { %1107 = shalt.err (!%p1104_p10)
}
  0x1a   :  { %s1108_s20 = scalar_lea.vmem %s37_s12, 12288  ;;  %p1113_p12 = scmp.lt.s32.totalorder %s37_s12, %s37_s12 }
  0x1b   :  { %p1109_p11 = scmp.ne.s32.totalorder %s37_s12, %s1108_s20  ;;  %p1114_p13 = scmp.lt.s32.totalorder %s1108_s20, %s1108_s20 }
  0x1d   :  { %p1115_p0 = por %p1114_p13, %p1113_p12 }
  0x1f   :  { %p1116_p1 = pnand %p1115_p0, %p1109_p11 }
  0x21   :  { %1119 = shalt.err (!%p1116_p1)
}
  0x22   :  { %s1152_s0 = smov 128   ;;  %s1153_s21 = smov 8  }
  0x23   :  { %42 = dma.hbm_to_vmem [thread:$0]  %s1590_s3, 12288, %s37_s12, [#allocation6], %s1152_s0, %s1152_s0, %s1153_s21  }
  0x24   :  { %1142 = dma.done.wait [#allocation3], 768  }
  0x25   :  { %1143 = vsyncadd [#allocation3], 4294966528 }
  0x26   :  { %1144 = dma.done.wait [#allocation6], 12288  }
  0x27   :  { %1145 = vsyncadd [#allocation6], 4294955008  ;;  %vm52_vm0 = vcmask 58368   ;;  %v51_v0 = vld [vmem:[%s1588_s1] sm:$0x3]  ;;  %v1154_v2 = vmov 1  }
  0x28   :  { %v53_v1 = vsel %vm52_vm0, %v51_v0, 0.0  ;;  %1063 = vset.pattern.permute.xlu1 %v1154_v2  ;;  %v1155_v3 = vmov 0   ;;  %v813_v8 = vld [vmem:[%s1589_s2] sm:$0x3]  ;;  %v500_v9 = vld [vmem:[#allocation5 + $0x80] sm:$0xff]  ;;  %v501_v10 = vld [vmem:[#allocation5 + $0x88] sm:$0xff] }
  0x29   :  { %54 = vadd.xlane.f32.xlu0 %v53_v1  ;;  %v951_v11 = vpack.c.bf16 %v501_v10, %v500_v9  ;;  %v484_v12 = vld [vmem:[#allocation5] sm:$0xff]  ;;  %v485_v13 = vld [vmem:[#allocation5 + $0x8] sm:$0xff]  ;;  %v1156_v19 = vmov 2   ;;  %v502_v22 = vld [vmem:[#allocation5 + $0x90] sm:$0xff]  ;;  %v1157_v27 = vmov 3   ;;  %v1158_v42 = vmov 4  }
  0x2a   :  { %1062 = vset.pattern.permute.xlu0 %v1155_v3  ;;  %v532_v14 = vld [vmem:[#allocation5 + $0x180] sm:$0xff]  ;;  %v953_v15 = vpack.c.bf16 %v485_v13, %v484_v12  ;;  %v533_v16 = vld [vmem:[#allocation5 + $0x188] sm:$0xff]  ;;  %v503_v23 = vld [vmem:[#allocation5 + $0x98] sm:$0xff]  ;;  %v1159_v57 = vmov 5   ;;  %v1160_v12 = vmov 6   ;;  %vm96_vm2 = vcmask 1041409  }
  0x2b   :  { %v516_v17 = vld [vmem:[#allocation5 + $0x100] sm:$0xff]  ;;  %v517_v18 = vld [vmem:[#allocation5 + $0x108] sm:$0xff]  ;;  %v983_v20 = vpack.c.bf16 %v533_v16, %v532_v14  ;;  %952 = vmatprep.subr.bf16.mxu0 %v951_v11  ;;  %v486_v24 = vld [vmem:[#allocation5 + $0x10] sm:$0xff]  ;;  %v955_v31 = vpack.c.bf16 %v503_v23, %v502_v22  ;;  %vm798_vm3 = vcmask 1041408  }
  0x2c   :  { %v985_v21 = vpack.c.bf16 %v517_v18, %v516_v17  ;;  %954 = vmatpush3.bf16.msra.mxu0 %v953_v15  ;;  %v487_v25 = vld [vmem:[#allocation5 + $0x18] sm:$0xff]  ;;  %v534_v26 = vld [vmem:[#allocation5 + $0x190] sm:$0xff]  ;;  %v504_v32 = vld [vmem:[#allocation5 + $0xa0] sm:$0xff] }
  0x2d   :  { %984 = vmatprep.subr.bf16.mxu1 %v983_v20  ;;  %v535_v28 = vld [vmem:[#allocation5 + $0x198] sm:$0xff]  ;;  %v518_v29 = vld [vmem:[#allocation5 + $0x110] sm:$0xff]  ;;  %v957_v33 = vpack.c.bf16 %v487_v25, %v486_v24  ;;  %v505_v36 = vld [vmem:[#allocation5 + $0xa8] sm:$0xff]  ;;  %956 = vmatprep.subr.bf16.mxu0 %v955_v31  ;;  %v1161_v31 = vmov 7  }
  0x2e   :  { %986 = vmatpush3.bf16.msra.mxu1 %v985_v21  ;;  %v519_v30 = vld [vmem:[#allocation5 + $0x118] sm:$0xff]  ;;  %v987_v34 = vpack.c.bf16 %v535_v28, %v534_v26  ;;  %v488_v37 = vld [vmem:[#allocation5 + $0x20] sm:$0xff]  ;;  %v489_v38 = vld [vmem:[#allocation5 + $0x28] sm:$0xff]  ;;  %v959_v46 = vpack.c.bf16 %v505_v36, %v504_v32 }
  0x2f   :  { %v989_v35 = vpack.c.bf16 %v519_v30, %v518_v29  ;;  %v536_v39 = vld [vmem:[#allocation5 + $0x1a0] sm:$0xff]  ;;  %v537_v40 = vld [vmem:[#allocation5 + $0x1a8] sm:$0xff]  ;;  %v506_v44 = vld [vmem:[#allocation5 + $0xb0] sm:$0xff]  ;;  %v961_v47 = vpack.c.bf16 %v489_v38, %v488_v37 }
  0x30   :  { %v520_v41 = vld [vmem:[#allocation5 + $0x120] sm:$0xff]  ;;  %958 = vmatpush3.bf16.msra.mxu0 %v957_v33  ;;  %v521_v43 = vld [vmem:[#allocation5 + $0x128] sm:$0xff]  ;;  %v507_v45 = vld [vmem:[#allocation5 + $0xb8] sm:$0xff]  ;;  %988 = vmatprep.subr.bf16.mxu1 %v987_v34  ;;  %v991_v48 = vpack.c.bf16 %v537_v40, %v536_v39 }
  0x31   :  { %960 = vmatprep.subr.bf16.mxu0 %v959_v46  ;;  %v993_v49 = vpack.c.bf16 %v521_v43, %v520_v41  ;;  %v963_v50 = vpack.c.bf16 %v507_v45, %v506_v44  ;;  %v490_v51 = vld [vmem:[#allocation5 + $0x30] sm:$0xff]  ;;  %v491_v52 = vld [vmem:[#allocation5 + $0x38] sm:$0xff]  ;;  %v508_v58 = vld [vmem:[#allocation5 + $0xc0] sm:$0xff] }
  0x32   :  { %990 = vmatpush3.bf16.msra.mxu1 %v989_v35  ;;  %v538_v53 = vld [vmem:[#allocation5 + $0x1b0] sm:$0xff]  ;;  %v539_v54 = vld [vmem:[#allocation5 + $0x1b8] sm:$0xff]  ;;  %v509_v59 = vld [vmem:[#allocation5 + $0xc8] sm:$0xff] }
  0x33   :  { %992 = vmatprep.subr.bf16.mxu1 %v991_v48  ;;  %v522_v55 = vld [vmem:[#allocation5 + $0x130] sm:$0xff]  ;;  %v523_v56 = vld [vmem:[#allocation5 + $0x138] sm:$0xff]  ;;  %v492_v60 = vld [vmem:[#allocation5 + $0x40] sm:$0xff]  ;;  %v995_v1 = vpack.c.bf16 %v539_v54, %v538_v53  ;;  %v967_v10 = vpack.c.bf16 %v509_v59, %v508_v58 }
  0x34   :  { %962 = vmatpush3.bf16.msra.mxu0 %v961_v47  ;;  %v493_v61 = vld [vmem:[#allocation5 + $0x48] sm:$0xff]  ;;  %v540_v62 = vld [vmem:[#allocation5 + $0x1c0] sm:$0xff]  ;;  %v997_v2 = vpack.c.bf16 %v523_v56, %v522_v55  ;;  %v543_v9 = vld [vmem:[#allocation5 + $0x1d8] sm:$0xff] }
  0x35   :  { %964 = vmatprep.subr.bf16.mxu0 %v963_v50  ;;  %v541_v63 = vld [vmem:[#allocation5 + $0x1c8] sm:$0xff]  ;;  %v524_v3 = vld [vmem:[#allocation5 + $0x140] sm:$0xff]  ;;  %v969_v11 = vpack.c.bf16 %v493_v61, %v492_v60  ;;  %v494_v15 = vld [vmem:[#allocation5 + $0x50] sm:$0xff] }
  0x36   :  { %994 = vmatpush3.bf16.msra.mxu1 %v993_v49  ;;  %v999_v13 = vpack.c.bf16 %v541_v63, %v540_v62  ;;  %v495_v16 = vld [vmem:[#allocation5 + $0x58] sm:$0xff]  ;;  %v526_v17 = vld [vmem:[#allocation5 + $0x150] sm:$0xff]  ;;  %v512_v21 = vld [vmem:[#allocation5 + $0xe0] sm:$0xff] }
  0x37   :  { %996 = vmatprep.subr.bf16.mxu1 %v995_v1  ;;  %v527_v20 = vld [vmem:[#allocation5 + $0x158] sm:$0xff]  ;;  %v513_v22 = vld [vmem:[#allocation5 + $0xe8] sm:$0xff]  ;;  %v544_v23 = vld [vmem:[#allocation5 + $0x1e0] sm:$0xff]  ;;  %v973_v25 = vpack.c.bf16 %v495_v16, %v494_v15 }
  0x38   :  { %v545_v24 = vld [vmem:[#allocation5 + $0x1e8] sm:$0xff]  ;;  %v1005_v26 = vpack.c.bf16 %v527_v20, %v526_v17  ;;  %v496_v28 = vld [vmem:[#allocation5 + $0x60] sm:$0xff]  ;;  %v514_v34 = vld [vmem:[#allocation5 + $0xf0] sm:$0xff] }
  0x39   :  { %v497_v29 = vld [vmem:[#allocation5 + $0x68] sm:$0xff]  ;;  %v528_v30 = vld [vmem:[#allocation5 + $0x160] sm:$0xff]  ;;  %v1007_v32 = vpack.c.bf16 %v545_v24, %v544_v23  ;;  %v515_v35 = vld [vmem:[#allocation5 + $0xf8] sm:$0xff] }
  0x3a   :  { %998 = vmatpush3.bf16.msra.mxu1 %v997_v2  ;;  %v529_v33 = vld [vmem:[#allocation5 + $0x168] sm:$0xff]  ;;  %v546_v36 = vld [vmem:[#allocation5 + $0x1f0] sm:$0xff]  ;;  %v547_v37 = vld [vmem:[#allocation5 + $0x1f8] sm:$0xff]  ;;  %v977_v38 = vpack.c.bf16 %v497_v29, %v496_v28  ;;  %v979_v40 = vpack.c.bf16 %v515_v35, %v514_v34 }
  0x3b   :  { %1000 = vmatprep.subr.bf16.mxu1 %v999_v13  ;;  %v1009_v39 = vpack.c.bf16 %v529_v33, %v528_v30  ;;  %v498_v41 = vld [vmem:[#allocation5 + $0x70] sm:$0xff]  ;;  %v1011_v43 = vpack.c.bf16 %v547_v37, %v546_v36  ;;  %v531_v45 = vld [vmem:[#allocation5 + $0x178] sm:$0xff]  ;;  %v564_v46 = vld [vmem:[#allocation5 + $0x280] sm:$0xff] }
  0x3c   :  { %v530_v44 = vld [vmem:[#allocation5 + $0x170] sm:$0xff]  ;;  %v565_v47 = vld [vmem:[#allocation5 + $0x288] sm:$0xff]  ;;  %v1240_v53 = vld [vmem:[#allocation2 + $0x10] sm:$0x11] }
  0x3d   :  { %v1015_v49 = vpack.c.bf16 %v565_v47, %v564_v46  ;;  %v60_v50 = vld [vmem:[#allocation2] sm:$0x11]  ;;  %v63_v55 = vld [vmem:[#allocation2 + $0x18] sm:$0x11]  ;;  %v71_v59 = vunpack.c.h.bf16 %v1240_v53  ;;  %v1245_v61 = vld [vmem:[#allocation2 + $0x28] sm:$0x11] }
  0x3e   :  { %v67_v54 = vunpack.c.h.bf16 %v60_v50  ;;  %1602 = vst [vmem:[#allocation11_spill] sm:$0xff] %v1245_v61  ;;  %v72_v62 = vunpack.c.l.bf16 %v63_v55  ;;  %v1249_v1 = vld [vmem:[#allocation2 + $0x18] sm:$0x22]  ;;  %v73_v2 = vunpack.c.h.bf16 %v63_v55  ;;  %v1259_v13 = vld [vmem:[#allocation2 + $0x10] sm:$0x22] }
  0x3f   :  { %1603 = vst [vmem:[#allocation12_spill] sm:$0xff] %v1259_v13  ;;  %v166_v17 = vunpack.c.l.bf16 %v1249_v1  ;;  %v165_v24 = vunpack.c.h.bf16 %v1259_v13  ;;  %v1302_v47 = vld [vmem:[#allocation2] sm:$0x44] }
  0x40   :  { %v126_v63 = vrot.slane %v67_v54, 1  ;;  %v95_v20 = vrot.slane %v72_v62, 7  ;;  %v1322_v55 = vld [vmem:[#allocation2 + $0x20] sm:$0x44] }
  0xb6   :  { %v55_v4 = vpop.xlane.xlu0 %54 }
  0xb7   :  { %vm56_vm1 = vcmp.ne.f32.partialorder %v55_v4, 0.0 }
  0xb8   :  { %v57_v5 = vsel %vm56_vm1, %v55_v4, 1.0  ;;  %v525_v4 = vld [vmem:[#allocation5 + $0x148] sm:$0xff] }
  0xb9   :  { %1070 = vrcp.f32 %v57_v5  ;;  %v510_v5 = vld [vmem:[#allocation5 + $0xd0] sm:$0xff]  ;;  %v1001_v14 = vpack.c.bf16 %v525_v4, %v524_v3 }
  0xbb   :  { %1002 = vmatpush3.bf16.msra.mxu1 %v1001_v14  ;;  %v1261_v14 = vld [vmem:[#allocation2 + $0x28] sm:$0x22] }
  0xbc   :  { %1604 = vst [vmem:[#allocation13_spill] sm:$0xff] %v1261_v14 }
  0xc3   :  { %v1071_v6 = vpop.eup %1070 }
  0xc4   :  { %v1225_v7 = vmul.f32 %v1071_v6, %v51_v0  ;;  %v965_v0 = vpack.c.bf16 %v491_v52, %v490_v51  ;;  %v511_v6 = vld [vmem:[#allocation5 + $0xd8] sm:$0xff]  ;;  %v66_v52 = vunpack.c.l.bf16 %v60_v50 }
  0xc5   :  { %v971_v18 = vpack.c.bf16 %v511_v6, %v510_v5  ;;  %v1238_v51 = vld [vmem:[#allocation2 + $0x8] sm:$0x11]  ;;  %v1251_v6 = vld [vmem:[#allocation2 + $0x8] sm:$0x22] }
  0xc6   :  { %121 = vperm.xlu1 %1063, %v1225_v7   ;;  %80 = vperm.xlu0 %1062, %v1225_v7   ;;  %v68_v56 = vunpack.c.l.bf16 %v1238_v51  ;;  %v69_v58 = vunpack.c.h.bf16 %v1238_v51  ;;  %v124_v60 = vrot.slane %v66_v52, 1  ;;  %v163_v23 = vunpack.c.h.bf16 %v1251_v6 }
  0xc7   :  { %966 = vmatpush3.bf16.msra.mxu0 %v965_v0  ;;  %v1247_v0 = vld [vmem:[#allocation2] sm:$0x22] }
  0xc8   :  { %968 = vmatprep.subr.bf16.mxu0 %v967_v10  ;;  %v128_v5 = vrot.slane %v68_v56, 1  ;;  %v1257_v10 = vsel %vm96_vm2, %v72_v62, %v124_v60  ;;  %v160_v15 = vunpack.c.l.bf16 %v1247_v0  ;;  %v161_v16 = vunpack.c.h.bf16 %v1247_v0 }
  0xc9   :  { %v229_v60 = vrot.slane %v166_v17, 2 }
  0xca   :  { %1064 = vset.pattern.permute.xlu1 %v1156_v19  ;;  %815 = vperm.xlu0 %1062, %v813_v8   ;;  %v542_v8 = vld [vmem:[#allocation5 + $0x1d0] sm:$0xff]  ;;  %v191_v33 = vrot.slane %v161_v16, 2 }
  0xcb   :  { %173 = vperm.xlu1 %1064, %v1225_v7   ;;  %v1003_v19 = vpack.c.bf16 %v543_v9, %v542_v8  ;;  %970 = vmatpush3.bf16.msra.mxu0 %v969_v11  ;;  %v1253_v8 = vld [vmem:[#allocation2 + $0x20] sm:$0x22]  ;;  %v77_v9 = vunpack.c.h.bf16 %v1245_v61  ;;  %v130_v11 = vrot.slane %v69_v58, 1 }
  0xcc   :  { %972 = vmatprep.subr.bf16.mxu0 %v971_v18  ;;  %v167_v18 = vunpack.c.h.bf16 %v1249_v1 }
  0xcd   :  { %1004 = vmatprep.subr.bf16.mxu1 %v1003_v19  ;;  %v1268_v19 = vsel %vm96_vm2, %v73_v2, %v126_v63  ;;  %v106_v30 = vrot.slane %v77_v9, 7  ;;  %v243_v63 = vrot.slane %v165_v24, 3 }
  0xce   :  { %1006 = vmatpush3.bf16.msra.mxu1 %v1005_v26  ;;  %v171_v26 = vunpack.c.h.bf16 %v1261_v14  ;;  %v192_v34 = vrot.slane %v167_v18, 1 }
  0xcf   :  { %1065 = vset.pattern.permute.xlu1 %v1157_v27  ;;  %v975_v27 = vpack.c.bf16 %v513_v22, %v512_v21  ;;  %974 = vmatpush3.bf16.msra.mxu0 %v973_v25  ;;  %v162_v21 = vunpack.c.l.bf16 %v1251_v6  ;;  %v168_v22 = vunpack.c.l.bf16 %v1253_v8  ;;  %v169_v25 = vunpack.c.h.bf16 %v1253_v8 }
  0xd0   :  { %225 = vperm.xlu1 %1065, %v1225_v7   ;;  %1008 = vmatprep.subr.bf16.mxu1 %v1007_v32  ;;  %v189_v32 = vrot.slane %v166_v17, 1  ;;  %v1312_v50 = vsel %vm96_vm2, %v106_v30, %v71_v59 }
  0xd1   :  { %976 = vmatprep.subr.bf16.mxu0 %v975_v27  ;;  %v98_v27 = vrot.slane %v73_v2, 7  ;;  %v194_v37 = vrot.slane %v162_v21, 2  ;;  %v234_v62 = vrot.slane %v162_v21, 3  ;;  %v244_v2 = vrot.slane %v171_v26, 2 }
  0xd2   :  { %1010 = vmatpush3.bf16.msra.mxu1 %v1009_v39  ;;  %v197_v39 = vrot.slane %v163_v23, 2 }
  0xd3   :  { %978 = vmatpush3.bf16.msra.mxu0 %v977_v38  ;;  %1012 = vmatprep.subr.bf16.mxu1 %v1011_v43  ;;  %v195_v38 = vrot.slane %v168_v22, 1  ;;  %v1356_v30 = vsel %vm96_vm2, %v244_v2, %v243_v63 }
  0xd4   :  { %1066 = vset.pattern.permute.xlu1 %v1158_v42  ;;  %v499_v42 = vld [vmem:[#allocation5 + $0x78] sm:$0xff]  ;;  %980 = vmatprep.subr.bf16.mxu0 %v979_v40  ;;  %v198_v40 = vrot.slane %v169_v25, 1 }
  0xd5   :  { %283 = vperm.xlu1 %1066, %v1225_v7   ;;  %v981_v48 = vpack.c.bf16 %v499_v42, %v498_v41  ;;  %v203_v41 = vrot.slane %v165_v24, 2  ;;  %v204_v42 = vrot.slane %v171_v26, 1  ;;  %v1337_v17 = vsel %vm96_vm2, %v195_v38, %v194_v37 }
  0xd7   :  { %982 = vmatpush3.bf16.msra.mxu0 %v981_v48  ;;  %v1304_v48 = vld [vmem:[#allocation2 + $0x8] sm:$0x44]  ;;  %v1343_v21 = vsel %vm96_vm2, %v204_v42, %v203_v41 }
  0xd8   :  { %1016 = vmatprep.subr.bf16.mxu0 %v1015_v49 }
  0xd9   :  { %1067 = vset.pattern.permute.xlu1 %v1159_v57  ;;  %v64_v57 = vld [vmem:[#allocation2 + $0x20] sm:$0x11] }
  0xda   :  { %335 = vperm.xlu1 %1067, %v1225_v7   ;;  %v74_v3 = vunpack.c.l.bf16 %v64_v57  ;;  %v75_v4 = vunpack.c.h.bf16 %v64_v57  ;;  %v228_v57 = vrot.slane %v160_v15, 3 }
  0xdc   :  { %v100_v28 = vrot.slane %v74_v3, 7  ;;  %v102_v29 = vrot.slane %v75_v4, 7  ;;  %v1281_v35 = vsel %vm96_vm2, %v74_v3, %v128_v5  ;;  %v1284_v36 = vsel %vm96_vm2, %v75_v4, %v130_v11  ;;  %v1328_v4 = vld [vmem:[#allocation2] sm:$0x88]  ;;  %v1330_v5 = vld [vmem:[#allocation2 + $0x18] sm:$0x88] }
  0xdd   :  { %v1597_v3 = vunpack.c.l.bf16 %v1304_v48  ;;  %v1347_v24 = vsel %vm96_vm2, %v229_v60, %v228_v57 }
  0xde   :  { %1068 = vset.pattern.permute.xlu1 %v1160_v12  ;;  %v134_v12 = vrot.slane %v71_v59, 1  ;;  %v1300_v46 = vsel %vm96_vm2, %v100_v28, %v68_v56  ;;  %v1309_v49 = vsel %vm96_vm2, %v102_v29, %v69_v58  ;;  %v1324_v56 = vld [vmem:[#allocation2 + $0x28] sm:$0x44]  ;;  %v235_v58 = vrot.slane %v168_v22, 2 }
  0xdf   :  { %393 = vperm.xlu1 %1068, %v1225_v7   ;;  %v270_v59 = vunpack.c.l.bf16 %v1302_v47  ;;  %v271_v22 = vunpack.c.h.bf16 %v1302_v47  ;;  %v387_v28 = vunpack.c.h.bf16 %v1330_v5  ;;  %v375_v47 = vld [vmem:[#allocation2 + $0x8] sm:$0x88] }
  0xe0   :  { %v1291_v43 = vsel %vm96_vm2, %v77_v9, %v134_v12  ;;  %v1596_v12 = vunpack.c.l.bf16 %v1322_v55  ;;  %v1353_v29 = vsel %vm96_vm2, %v235_v58, %v234_v62  ;;  %v378_v58 = vld [vmem:[#allocation2 + $0x20] sm:$0x88] }
  0xe1   :  { %v301_v41 = vrot.slane %v271_v22, 4  ;;  %v341_v42 = vrot.slane %v271_v22, 5  ;;  %v412_v62 = vrot.slane %v387_v28, 5  ;;  %v452_v2 = vrot.slane %v387_v28, 6 }
  0xe2   :  { %v389_v28 = vunpack.c.h.bf16 %v378_v58 }
  0xe3   :  { %1069 = vset.pattern.permute.xlu1 %v1161_v31  ;;  %v188_v31 = vrot.slane %v160_v15, 2  ;;  %v1595_v15 = vunpack.c.h.bf16 %v1324_v56 }
  0xe4   :  { %445 = vperm.xlu1 %1069, %v1225_v7   ;;  %v1013_v7 = vpack.c.bf16 %v531_v45, %v530_v44  ;;  %v1294_v44 = vsel %vm96_vm2, %v95_v20, %v66_v52  ;;  %v1297_v45 = vsel %vm96_vm2, %v98_v27, %v67_v54  ;;  %v1318_v52 = vsel %vm96_vm2, %v192_v34, %v191_v33  ;;  %v1320_v54 = vld [vmem:[#allocation2 + $0x18] sm:$0x44] }
  0xe5   :  { %v1315_v51 = vsel %vm96_vm2, %v189_v32, %v188_v31  ;;  %v276_v11 = vunpack.c.l.bf16 %v1320_v54  ;;  %v1340_v20 = vsel %vm96_vm2, %v198_v40, %v197_v39  ;;  %v277_v26 = vunpack.c.h.bf16 %v1320_v54 }
  0xe6   :  { %1014 = vmatpush3.bf16.msra.mxu1 %v1013_v7  ;;  %v1306_v7 = vld [vmem:[#allocation2 + $0x10] sm:$0x44]  ;;  %v381_v27 = vunpack.c.h.bf16 %v1328_v4  ;;  %v298_v31 = vrot.slane %v270_v59, 4  ;;  %v304_v32 = vrot.slane %v1597_v3, 4  ;;  %v305_v34 = vrot.slane %v1596_v12, 3 }
  0xe7   :  { %v1594_v9 = vunpack.c.h.bf16 %v1306_v7  ;;  %v299_v33 = vrot.slane %v276_v11, 3  ;;  %v314_v38 = vrot.slane %v1595_v15, 3  ;;  %v231_v39 = vrot.slane %v161_v16, 3 }
  0xe8   :  { %v232_v40 = vrot.slane %v167_v18, 2  ;;  %v302_v54 = vrot.slane %v277_v26, 3  ;;  %v342_v57 = vrot.slane %v277_v26, 4  ;;  %v411_v60 = vrot.slane %v381_v27, 6 }
  0xe9   :  { %v313_v37 = vrot.slane %v1594_v9, 4  ;;  %v451_v63 = vrot.slane %v381_v27, 7  ;;  %v273_v9 = vunpack.c.h.bf16 %v1304_v48  ;;  %v279_v15 = vunpack.c.h.bf16 %v1322_v55 }
  0xea   :  { %v1375_v0 = vsel %vm96_vm2, %v299_v33, %v298_v31  ;;  %v1378_v1 = vsel %vm96_vm2, %v305_v34, %v304_v32  ;;  %v380_v18 = vunpack.c.l.bf16 %v1328_v4  ;;  %v1385_v22 = vsel %vm96_vm2, %v232_v40, %v231_v39 }
  0xeb   :  { %v1381_v16 = vsel %vm96_vm2, %v314_v38, %v313_v37  ;;  %v386_v26 = vunpack.c.l.bf16 %v1330_v5  ;;  %v383_v27 = vunpack.c.h.bf16 %v375_v47  ;;  %v1389_v3 = vsel %vm96_vm2, %v302_v54, %v301_v41 }
  0xec   :  { %v1392_v31 = vsel %vm96_vm2, %v342_v57, %v341_v42  ;;  %v1395_v32 = vsel %vm96_vm2, %v412_v62, %v411_v60  ;;  %v237_v33 = vrot.slane %v163_v23, 3  ;;  %v1400_v4 = vsel %vm96_vm2, %v452_v2, %v451_v63 }
  0xed   :  { %v238_v5 = vrot.slane %v169_v25, 2  ;;  %v307_v34 = vrot.slane %v273_v9, 4  ;;  %v308_v37 = vrot.slane %v279_v15, 3  ;;  %v347_v38 = vrot.slane %v273_v9, 5 }
  0xee   :  { %v348_v39 = vrot.slane %v279_v15, 4  ;;  %v382_v40 = vunpack.c.l.bf16 %v375_v47  ;;  %v388_v41 = vunpack.c.l.bf16 %v378_v58  ;;  %v417_v54 = vrot.slane %v383_v27, 6  ;;  %v1414_v58 = vld [vmem:[#allocation2 + $0x10] sm:$0x88] }
  0xef   :  { %v418_v57 = vrot.slane %v389_v28, 5  ;;  %v338_v60 = vrot.slane %v270_v59, 5  ;;  %v339_v62 = vrot.slane %v276_v11, 4  ;;  %v457_v6 = vrot.slane %v383_v27, 7 }
  0xf0   :  { %v458_v23 = vrot.slane %v389_v28, 6  ;;  %v408_v14 = vrot.slane %v380_v18, 6  ;;  %v409_v63 = vrot.slane %v386_v26, 5  ;;  %v239_v2 = vsel %vm96_vm2, %v238_v5, %v237_v33  ;;  %v1420_v33 = vld [vmem:[#allocation2 + $0x28] sm:$0x88] }
  0xf1   :  { %v1408_v8 = vsel %vm96_vm2, %v308_v37, %v307_v34  ;;  %v1605_v25 = vunpack.c.l.bf16 %v1304_v48  ;;  %v1606_v15 = vunpack.c.l.bf16 %v1322_v55  ;;  %v414_v13 = vrot.slane %v382_v40, 6 }
  0xf2   :  { %v415_v59 = vrot.slane %v388_v41, 5  ;;  %v1607_v11 = vunpack.c.h.bf16 %v1306_v7  ;;  %v1608_v28 = vunpack.c.h.bf16 %v1324_v56  ;;  %v1423_v5 = vsel %vm96_vm2, %v348_v39, %v347_v38 }
  0xf3   :  { %v344_v9 = vrot.slane %v1605_v25, 5  ;;  %v345_v47 = vrot.slane %v1606_v15, 4  ;;  %v1426_v48 = vsel %vm96_vm2, %v418_v57, %v417_v54  ;;  %v1429_v55 = vsel %vm96_vm2, %v339_v62, %v338_v60 }
  0xf4   :  { %v353_v27 = vrot.slane %v1607_v11, 5  ;;  %v354_v61 = vrot.slane %v1608_v28, 4  ;;  %v1431_v34 = vrot.slane %v380_v18, 7  ;;  %v1438_v15 = vsel %vm96_vm2, %v458_v23, %v457_v6 }
  0xf5   :  { %v1441_v11 = vsel %vm96_vm2, %v409_v63, %v408_v14  ;;  %v1443_v38 = vrot.slane %v386_v26, 6  ;;  %v385_v39 = vunpack.c.h.bf16 %v1414_v58  ;;  %v346_v54 = vsel %vm96_vm2, %v345_v47, %v344_v9 }
  0xf6   :  { %v1447_v57 = vrot.slane %v382_v40, 7  ;;  %v1449_v18 = vrot.slane %v388_v41, 6  ;;  %v391_v60 = vunpack.c.h.bf16 %v1420_v33  ;;  %v416_v14 = vsel %vm96_vm2, %v415_v59, %v414_v13 }
  0xf7   :  { %v355_v26 = vsel %vm96_vm2, %v354_v61, %v353_v27  ;;  %v1470_v61 = vrot.slane %v385_v39, 7 }
  0xf8   :  { %v464_v59 = vrot.slane %v391_v60, 6 }
 0x145   :  { %v1372_v12 = vpop.permute.xlu1 %121  ;;  %v1433_v37 = vpop.permute.xlu0 %80 }
 0x146   :  { %1609 = vst [vmem:[#allocation14_spill] sm:$0xff] %v1433_v37  ;;  %v142_v62 = vmul.f32 %v1257_v10, %v1372_v12  ;;  %v143_v6 = vmul.f32 %v1268_v19, %v1372_v12  ;;  %v144_v23 = vmul.f32 %v1281_v35, %v1372_v12  ;;  %v114_v40 = vmul.f32 %v1294_v44, %v1433_v37 }
 0x147   :  { %v115_v41 = vmul.f32 %v1297_v45, %v1433_v37  ;;  %v116_v63 = vmul.f32 %v1300_v46, %v1433_v37  ;;  %v147_v10 = vmul.f32 %v1291_v43, %v1372_v12  ;;  %v119_v13 = vmul.f32 %v1312_v50, %v1433_v37 }
 0x148   :  { %v423_v19 = vrot.slane %v385_v39, 6  ;;  %v145_v35 = vmul.f32 %v1284_v36, %v1372_v12  ;;  %v117_v44 = vmul.f32 %v1309_v49, %v1433_v37  ;;  %v424_v46 = vrot.slane %v391_v60, 5 }
 0x149   :  { %v148_v36 = vadd.f32 %v142_v62, %v114_v40  ;;  %v150_v27 = vadd.f32 %v144_v23, %v116_v63  ;;  %v149_v28 = vadd.f32 %v143_v6, %v115_v41 }
 0x14a   :  { %v1404_v42 = vpop.permute.xlu1 %173  ;;  %v151_v60 = vadd.f32 %v145_v35, %v117_v44 }
 0x14b   :  { %v212_v45 = vmul.f32 %v1315_v51, %v1404_v42  ;;  %v213_v43 = vmul.f32 %v1318_v52, %v1404_v42  ;;  %v214_v50 = vmul.f32 %v1337_v17, %v1404_v42  ;;  %v217_v47 = vmul.f32 %v1343_v21, %v1404_v42 }
 0x14c   :  { %v215_v49 = vmul.f32 %v1340_v20, %v1404_v42  ;;  %v153_v51 = vadd.f32 %v147_v10, %v119_v13  ;;  %v425_v13 = vsel %vm96_vm2, %v424_v46, %v423_v19 }
 0x14d   :  { %v218_v37 = vadd.f32 %v212_v45, %v148_v36  ;;  %v220_v23 = vadd.f32 %v214_v50, %v150_v27 }
 0x14e   :  { %v223_v20 = vadd.f32 %v217_v47, %v153_v51  ;;  %v221_v41 = vadd.f32 %v215_v49, %v151_v60  ;;  %v548_v51 = vld [vmem:[#allocation5 + $0x200] sm:$0xff] }
 0x14f   :  { %v1435_v25 = vpop.permute.xlu1 %225 }
 0x150   :  { %v252_v39 = vmul.f32 %v1347_v24, %v1435_v25  ;;  %v254_v52 = vmul.f32 %v1353_v29, %v1435_v25  ;;  %v257_v17 = vmul.f32 %v1356_v30, %v1435_v25  ;;  %v253_v21 = vmul.f32 %v1385_v22, %v1435_v25 }
 0x151   :  { %v255_v62 = vmul.f32 %v239_v2, %v1435_v25  ;;  %v219_v24 = vadd.f32 %v213_v43, %v149_v28 }
 0x152   :  { %v258_v63 = vadd.f32 %v252_v39, %v218_v37  ;;  %v260_v2 = vadd.f32 %v254_v52, %v220_v23  ;;  %v263_v10 = vadd.f32 %v257_v17, %v223_v20  ;;  %v549_v39 = vld [vmem:[#allocation5 + $0x208] sm:$0xff]  ;;  %v566_v23 = vld [vmem:[#allocation5 + $0x290] sm:$0xff]  ;;  %v567_v20 = vld [vmem:[#allocation5 + $0x298] sm:$0xff] }
 0x153   :  { %v259_v35 = vadd.f32 %v253_v21, %v219_v24 }
 0x154   :  { %v1478_v9 = vpop.permute.xlu1 %283 }
 0x155   :  { %v322_v6 = vmul.f32 %v1375_v0, %v1478_v9  ;;  %v324_v29 = vmul.f32 %v1378_v1, %v1478_v9  ;;  %v323_v30 = vmul.f32 %v1389_v3, %v1478_v9  ;;  %v325_v22 = vmul.f32 %v1408_v8, %v1478_v9 }
 0x156   :  { %v327_v0 = vmul.f32 %v1381_v16, %v1478_v9  ;;  %v261_v1 = vadd.f32 %v255_v62, %v221_v41 }
 0x157   :  { %v328_v45 = vadd.f32 %v322_v6, %v258_v63  ;;  %v329_v19 = vadd.f32 %v323_v30, %v259_v35  ;;  %v330_v50 = vadd.f32 %v324_v29, %v260_v2  ;;  %v1017_v6 = vpack.c.bf16 %v549_v39, %v548_v51  ;;  %v550_v63 = vld [vmem:[#allocation5 + $0x210] sm:$0xff]  ;;  %v568_v2 = vld [vmem:[#allocation5 + $0x2a0] sm:$0xff] }
 0x158   :  { %v331_v46 = vadd.f32 %v325_v22, %v261_v1  ;;  %v333_v27 = vadd.f32 %v327_v0, %v263_v10  ;;  %v1019_v22 = vpack.c.bf16 %v567_v20, %v566_v23  ;;  %v569_v10 = vld [vmem:[#allocation5 + $0x2a8] sm:$0xff]  ;;  %v552_v35 = vld [vmem:[#allocation5 + $0x220] sm:$0xff]  ;;  %v70_v1 = vunpack.c.l.bf16 %v1240_v53 }
 0x159   :  { %v1499_v40 = vpop.permute.xlu1 %335  ;;  %v1023_v0 = vpack.c.bf16 %v569_v10, %v568_v2  ;;  %v556_v39 = vld [vmem:[#allocation5 + $0x240] sm:$0xff] }
 0x15a   :  { %v363_v44 = vmul.f32 %v1392_v31, %v1499_v40  ;;  %v365_v3 = vmul.f32 %v1423_v5, %v1499_v40  ;;  %v362_v8 = vmul.f32 %v1429_v55, %v1499_v40  ;;  %v364_v37 = vmul.f32 %v346_v54, %v1499_v40 }
 0x15b   :  { %v367_v16 = vmul.f32 %v355_v26, %v1499_v40  ;;  %v450_v54 = vsel %vm96_vm2, %v1443_v38, %v1431_v34  ;;  %v456_v26 = vsel %vm96_vm2, %v1449_v18, %v1447_v57 }
 0x15c   :  { %v369_v36 = vadd.f32 %v363_v44, %v329_v19  ;;  %v371_v49 = vadd.f32 %v365_v3, %v331_v46  ;;  %v370_v28 = vadd.f32 %v364_v37, %v330_v50  ;;  %v553_v44 = vld [vmem:[#allocation5 + $0x228] sm:$0xff]  ;;  %v571_v37 = vld [vmem:[#allocation5 + $0x2b8] sm:$0xff] }
 0x15d   :  { %v1610_v3 = vld [vmem:[#allocation11_spill] sm:$0xff]  ;;  %v1611_v19 = vld [vmem:[#allocation12_spill] sm:$0xff]  ;;  %v1612_v50 = vld [vmem:[#allocation13_spill] sm:$0xff] }
 0x15e   :  { %v1517_v43 = vpop.permute.xlu1 %393  ;;  %v164_v46 = vunpack.c.l.bf16 %v1611_v19 }
 0x15f   :  { %v433_v31 = vmul.f32 %v1395_v32, %v1517_v43  ;;  %v435_v47 = vmul.f32 %v1426_v48, %v1517_v43  ;;  %v432_v5 = vmul.f32 %v1441_v11, %v1517_v43  ;;  %v434_v55 = vmul.f32 %v416_v14, %v1517_v43 }
 0x160   :  { %v368_v32 = vadd.f32 %v362_v8, %v328_v45  ;;  %v437_v48 = vmul.f32 %v425_v13, %v1517_v43  ;;  %v373_v11 = vadd.f32 %v367_v16, %v333_v27  ;;  %v465_v14 = vsel %vm96_vm2, %v464_v59, %v1470_v61  ;;  %v570_v8 = vld [vmem:[#allocation5 + $0x2b0] sm:$0xff]  ;;  %v573_v27 = vld [vmem:[#allocation5 + $0x2c8] sm:$0xff] }
 0x161   :  { %v439_v17 = vadd.f32 %v433_v31, %v369_v36  ;;  %v441_v34 = vadd.f32 %v435_v47, %v371_v49  ;;  %v440_v21 = vadd.f32 %v434_v55, %v370_v28  ;;  %v76_v45 = vunpack.c.l.bf16 %v1610_v3  ;;  %v555_v55 = vld [vmem:[#allocation5 + $0x238] sm:$0xff]  ;;  %v578_v3 = vld [vmem:[#allocation5 + $0x2f0] sm:$0xff] }
 0x162   :  { %v438_v38 = vadd.f32 %v432_v5, %v368_v32  ;;  %v443_v61 = vadd.f32 %v437_v48, %v373_v11  ;;  %v170_v16 = vunpack.c.l.bf16 %v1612_v50  ;;  %v1025_v31 = vpack.c.bf16 %v553_v44, %v552_v35  ;;  %v554_v5 = vld [vmem:[#allocation5 + $0x230] sm:$0xff]  ;;  %v557_v11 = vld [vmem:[#allocation5 + $0x248] sm:$0xff]  ;;  %v560_v35 = vld [vmem:[#allocation5 + $0x260] sm:$0xff] }
 0x163   :  { %v1536_v52 = vpop.permute.xlu1 %445  ;;  %v1027_v47 = vpack.c.bf16 %v571_v37, %v570_v8  ;;  %v132_v36 = vrot.slane %v70_v1, 1  ;;  %v200_v49 = vrot.slane %v164_v46, 2  ;;  %v274_v32 = vunpack.c.l.bf16 %v1306_v7  ;;  %v561_v44 = vld [vmem:[#allocation5 + $0x268] sm:$0xff] }
 0x164   :  { %v473_v57 = vmul.f32 %v1400_v4, %v1536_v52  ;;  %v475_v18 = vmul.f32 %v1438_v15, %v1536_v52  ;;  %v472_v60 = vmul.f32 %v450_v54, %v1536_v52  ;;  %v474_v62 = vmul.f32 %v456_v26, %v1536_v52  ;;  %v551_v4 = vld [vmem:[#allocation5 + $0x218] sm:$0xff]  ;;  %v572_v26 = vld [vmem:[#allocation5 + $0x2c0] sm:$0xff] }
 0x165   :  { %v477_v59 = vmul.f32 %v465_v14, %v1536_v52  ;;  %v1021_v13 = vpack.c.bf16 %v551_v4, %v550_v63  ;;  %v104_v54 = vrot.slane %v76_v45, 7  ;;  %v201_v53 = vrot.slane %v170_v16, 1  ;;  %v576_v63 = vld [vmem:[#allocation5 + $0x2e0] sm:$0xff]  ;;  %v577_v4 = vld [vmem:[#allocation5 + $0x2e8] sm:$0xff] }
 0x166   :  { %v479_v24 = vadd.f32 %v473_v57, %v439_v17  ;;  %v481_v29 = vadd.f32 %v475_v18, %v441_v34  ;;  %v478_v30 = vadd.f32 %v472_v60, %v438_v38  ;;  %v480_v41 = vadd.f32 %v474_v62, %v440_v21  ;;  %v574_v21 = vld [vmem:[#allocation5 + $0x2d0] sm:$0xff]  ;;  %v575_v57 = vld [vmem:[#allocation5 + $0x2d8] sm:$0xff] }
 0x167   :  { %v483_v15 = vadd.f32 %v477_v59, %v443_v61  ;;  %v280_v28 = vunpack.c.l.bf16 %v1324_v56  ;;  %v1029_v48 = vpack.c.bf16 %v555_v55, %v554_v5  ;;  %v1031_v51 = vpack.c.bf16 %v573_v27, %v572_v26  ;;  %v563_v5 = vld [vmem:[#allocation5 + $0x278] sm:$0xff] }
 0x168   :  { %651 = vmatprep.mubr.f32.mxu0 %v479_v24  ;;  %721 = vmatprep.mubr.f32.mxu1 %v481_v29  ;;  %v133_v14 = vsel %vm96_vm2, %v76_v45, %v132_v36  ;;  %v105_v17 = vsel %vm96_vm2, %v104_v54, %v70_v1  ;;  %v240_v34 = vrot.slane %v164_v46, 3  ;;  %v241_v38 = vrot.slane %v170_v16, 2  ;;  %v558_v24 = vld [vmem:[#allocation5 + $0x250] sm:$0xff]  ;;  %v559_v29 = vld [vmem:[#allocation5 + $0x258] sm:$0xff] }
 0x169   :  { %652 = vmatmul.mubr.f32.vlgmr.msra.gmra.mrb[0].mxu0 %v478_v30  ;;  %722 = vmatmul.mubr.f32.vlgmr.msra.gmra.mrb[0].mxu1 %v480_v41  ;;  %v202_v18 = vsel %vm96_vm2, %v201_v53, %v200_v49  ;;  %v310_v60 = vrot.slane %v274_v32, 4  ;;  %v311_v7 = vrot.slane %v280_v28, 3  ;;  %v384_v56 = vunpack.c.l.bf16 %v1414_v58  ;;  %v579_v45 = vld [vmem:[#allocation5 + $0x2f8] sm:$0xff] }
 0x16a   :  { %1018 = vmatpush3.bf16.msra.mxu0 %v1017_v6  ;;  %791 = vmatprep.mubr.f32.mxu0 %v483_v15  ;;  %v390_v62 = vunpack.c.l.bf16 %v1420_v33  ;;  %v1033_v23 = vpack.c.bf16 %v557_v11, %v556_v39  ;;  %v146_v20 = vmul.f32 %v133_v14, %v1372_v12  ;;  %v1613_v6 = vld [vmem:[#allocation14_spill] sm:$0xff]  ;;  %v1035_v59 = vpack.c.bf16 %v575_v57, %v574_v21  ;;  %v816_v57 = vpop.permute.xlu0 %815 }
 0x16b   :  { %1020 = vmatprep.subr.bf16.mxu0 %v1019_v22  ;;  %v118_v61 = vmul.f32 %v105_v17, %v1613_v6  ;;  %v242_v30 = vsel %vm96_vm2, %v241_v38, %v240_v34  ;;  %v350_v41 = vrot.slane %v274_v32, 5  ;;  %v351_v22 = vrot.slane %v280_v28, 4  ;;  %v845_v28 = vld [vmem:[%s1591_s4] ss:$0 sm:$0xff]  ;;  %s1162_s4 = smov [#allocation7]  }
 0x16c   :  { %v216_v58 = vmul.f32 %v202_v18, %v1404_v42  ;;  %v312_v33 = vsel %vm96_vm2, %v311_v7, %v310_v60  ;;  %v1037_v15 = vpack.c.bf16 %v559_v29, %v558_v24  ;;  %v420_v2 = vrot.slane %v384_v56, 6  ;;  %s831_s27 = sshll.u32 %s1162_s4, 4  ;;  %s832_s27 = int_to_ptr.vmem [resolvable:$true] %s831_s27 }
 0x16d   :  { %v421_v12 = vrot.slane %v390_v62, 5  ;;  %v152_v10 = vadd.f32 %v146_v20, %v118_v61  ;;  %v352_v1 = vsel %vm96_vm2, %v351_v22, %v350_v41  ;;  %v460_v8 = vrot.slane %v384_v56, 7  ;;  %s1120_s28 = scalar_lea.vmem %s832_s27, 32  ;;  %p1125_p3 = scmp.lt.s32.totalorder %s832_s27, %s832_s27 }
 0x16e   :  { %1022 = vmatpush3.bf16.msra.mxu0 %v1021_v13  ;;  %v256_v13 = vmul.f32 %v242_v30, %v1435_v25  ;;  %v461_v37 = vrot.slane %v390_v62, 6  ;;  %v326_v19 = vmul.f32 %v312_v33, %v1478_v9  ;;  %v1041_v46 = vpack.c.bf16 %v561_v44, %v560_v35  ;;  %p1121_p2 = scmp.ne.s32.totalorder %s832_s27, %s1120_s28  ;;  %p1126_p4 = scmp.lt.s32.totalorder %s1120_s28, %s1120_s28 }
 0x16f   :  { %1024 = vmatprep.subr.bf16.mxu0 %v1023_v0  ;;  %v1039_v0 = vpack.c.bf16 %v577_v4, %v576_v63  ;;  %v222_v42 = vadd.f32 %v216_v58, %v152_v10  ;;  %v422_v50 = vsel %vm96_vm2, %v421_v12, %v420_v2  ;;  %v366_v25 = vmul.f32 %v352_v1, %v1499_v40 }
 0x170   :  { %v462_v55 = vsel %vm96_vm2, %v461_v37, %v460_v8  ;;  %v436_v54 = vmul.f32 %v422_v50, %v1517_v43  ;;  %v811_v17 = vlaneseq  ;;  %p1127_p5 = por %p1126_p4, %p1125_p3 }
 0x171   :  { %v262_v16 = vadd.f32 %v256_v13, %v222_v42  ;;  %v476_v27 = vmul.f32 %v462_v55, %v1536_v52 }
 0x172   :  { %1026 = vmatpush3.bf16.msra.mxu0 %v1025_v31  ;;  %v1043_v31 = vpack.c.bf16 %v579_v45, %v578_v3  ;;  %v812_v52 = vand.u32 127, %v811_v17  ;;  %p1128_p6 = pnand %p1127_p5, %p1121_p2 }
 0x173   :  { %1028 = vmatprep.subr.bf16.mxu0 %v1027_v47  ;;  %v562_v47 = vld [vmem:[#allocation5 + $0x270] sm:$0xff]  ;;  %v332_v36 = vadd.f32 %v326_v19, %v262_v16 }
 0x174   :  { %v1045_v26 = vpack.c.bf16 %v563_v5, %v562_v47  ;;  %vm817_vm4 = vcmp.eq.s32.totalorder %v812_v52, %v816_v57 }
 0x175   :  { %v372_v9 = vadd.f32 %v366_v25, %v332_v36 }
 0x176   :  { %1030 = vmatpush3.bf16.msra.mxu0 %v1029_v48 }
 0x177   :  { %1032 = vmatprep.subr.bf16.mxu0 %v1031_v51  ;;  %v442_v49 = vadd.f32 %v436_v54, %v372_v9 }
 0x179   :  { %v482_v53 = vadd.f32 %v476_v27, %v442_v49 }
 0x17a   :  { %1034 = vmatpush3.bf16.msra.mxu0 %v1033_v23 }
 0x17b   :  { %1036 = vmatprep.subr.bf16.mxu0 %v1035_v59 }
 0x17e   :  { %1038 = vmatpush3.bf16.msra.mxu0 %v1037_v15 }
 0x17f   :  { %1040 = vmatprep.subr.bf16.mxu0 %v1039_v0 }
 0x182   :  { %1042 = vmatpush3.bf16.msra.mxu0 %v1041_v46 }
 0x183   :  { %1044 = vmatprep.subr.bf16.mxu0 %v1043_v31 }
 0x186   :  { %1046 = vmatpush3.bf16.msra.mxu0 %v1045_v26 }
 0x189   :  { %792 = vmatmul.mubr.f32.vlgmr.msra.gmra.mrb[2].mxu0 %v482_v53 }
 0x23c   :  { %v878_v40 = vpop.f32.mrb[0].mxu0  ;;  %v913_v32 = vpop.f32.mrb[0].mxu1 }
 0x23d   :  { %v879_v48 = vpop.f32.mrb[1].mxu0  ;;  %v914_v51 = vpop.f32.mrb[1].mxu1 }
 0x23e   :  { %v880_v39 = vadd.f32 %v879_v48, %v878_v40  ;;  %v915_v43 = vadd.f32 %v914_v51, %v913_v32 }
 0x240   :  { %v654_v11 = vadd.f32 %v880_v39, %v845_v28 }
 0x242   :  { %v724_v14 = vadd.f32 %v915_v43, %v654_v11 }
 0x25c   :  { %v948_v34 = vpop.f32.mrb[2].mxu0 }
 0x25d   :  { %v949_v38 = vpop.f32.mrb[3].mxu0 }
 0x25e   :  { %v950_v21 = vadd.f32 %v949_v38, %v948_v34 }
 0x260   :  { %v794_v18 = vadd.f32 %v950_v21, %v724_v14 }
 0x262   :  { %797 = vst [vmem:[#allocation7] sm:$0x3] %v794_v18  ;;  %v799_v60 = vsel %vm798_vm3, %v794_v18, -inf  ;;  %v818_v7 = vsel %vm817_vm4, %v794_v18, 0.0 }
 0x263   :  { %800 = vmax.xlane.f32.xlu1 %v799_v60  ;;  %v819_v56 = vsel %vm798_vm3, %v818_v7, 0.0 }
 0x267   :  { %820 = vadd.xlane.f32.xlu1 %v819_v56 }
 0x2f0   :  { %v801_v62 = vpop.xlane.xlu1 %800 }
 0x2f1   :  { %v802_v23 = vsub.f32 %v794_v18, %v801_v62 }
 0x2f3   :  { %v803_v20 = vmul.f32 1.442695, %v802_v23 }
 0x2f5   :  { %1072 = vpow2.f32 %v803_v20 }
 0x2ff   :  { %v1073_v6 = vpop.eup %1072 }
 0x300   :  { %v805_v61 = vsel %vm798_vm3, %v1073_v6, 0.0 }
 0x301   :  { %806 = vadd.xlane.f32.xlu0 %v805_v61 }
 0x302   :  { %1131 = shalt.err (!%p1128_p6)
}
 0x303   :  { %s1132_s7 = scalar_lea.hbm %s1592_s5, 32 }
 0x304   :  { %p1133_p7 = scmp.ne.s32.totalorder %s1592_s5, %s1132_s7  ;;  %p1136_p8 = scmp.lt.u32.totalorder %s1132_s7, %s1592_s5 }
 0x306   :  { %p1138_p9 = pnand %p1136_p8, %p1133_p7 }
 0x308   :  { %1141 = shalt.err (!%p1138_p9)
}
 0x309   :  { %834 = dma.vmem_to_hbm [thread:$0]  %s832_s27, 32, %s1592_s5, [#allocation4]   ;;  %v821_v41 = vpop.xlane.xlu1 %820  ;;  %vm823_vm5 = vcmask 1024  }
 0x38e   :  { %v807_v59 = vpop.xlane.xlu0 %806 }
 0x38f   :  { %1074 = vlog2.f32 %v807_v59 }
 0x399   :  { %v1075_v24 = vpop.eup %1074 }
 0x39a   :  { %v809_v29 = vmul.f32 0.6931472, %v1075_v24 }
 0x39c   :  { %v810_v30 = vadd.f32 %v809_v29, %v801_v62 }
 0x39e   :  { %v822_v22 = vsub.f32 %v810_v30, %v821_v41 }
 0x3a0   :  { %824 = vst.msk [vmem:[%s1593_s6] sm:$0x3] %vm823_vm5, %v822_v22 }
 0x3a1   :  { %1146 = dma.done.wait [#allocation4], 32  }
 0x3a2   :  { %1147 = vsyncadd [#allocation4], 4294967264 }
 0x3a3   :  { %842 = vsyncpa [#allocation3], 1 }
 0x3a4   :  { %843 = vsyncpa [#allocation6], 1 }
 0x3a5   :  { %844 = vsyncpa [#allocation4], 1 }

</bundles_post_ra>
